<compile_context>
chip_gen: v7x
topology: tpu7x:2x2x1
jax: 0.10.0
libtpu: 0.0.40
codegen_flags: <defaults>
</compile_context>

<pallas_src>
import jax
import jax.numpy as jnp
from jax.experimental import pallas as pl
from jax.experimental.pallas import tpu as pltpu


def _round_up(x, m):
    return ((x + m - 1) // m) * m


def feedforward_kernel(x_ref, w1_ref, b1_ref, w2_ref, b2_ref, o_ref):
    # fc1 on the MXU: (TB, D) @ (D, H), accumulate in f32.
    h = jnp.dot(x_ref[...], w1_ref[...], preferred_element_type=jnp.float32)
    # bias + ReLU on the VPU.
    h = jnp.maximum(h + b1_ref[...], 0.0)
    # fc2 as VPU multiply + lane reduction (avoids a skinny (H, 1) MXU matmul):
    # w2_ref is a (1, H) row broadcast over the TB rows; b2 is an SMEM scalar.
    out = jnp.sum(h * w2_ref[...], axis=-1, keepdims=True) + b2_ref[0, 0]
    o_ref[...] = out.astype(o_ref.dtype)


def feedforward(x, fc1_w, fc1_b, fc2_w, fc2_b, *, tb_max=2048):
    """Forward pass of the Feedforward module.

    x:      (B, D)
    fc1_w:  (H, D)   PyTorch Linear layout
    fc1_b:  (H,)
    fc2_w:  (1, H)
    fc2_b:  (1,)
    returns (B, 1)
    """
    B, D = x.shape
    H = fc1_w.shape[0]

    # One-time layout prep outside the kernel (negligible cost).
    w1 = fc1_w.T.astype(x.dtype)                  # (D, H)
    b1 = fc1_b.reshape(1, H).astype(jnp.float32)  # (1, H)
    w2 = fc2_w.reshape(1, H).astype(jnp.float32)  # (1, H) row, H on lanes
    b2 = fc2_b.reshape(1, 1).astype(jnp.float32)  # (1, 1) scalar -> SMEM

    # Batch tile: multiple of 8 sublanes, as large as practical.  The grid is
    # a ceiling divide; Pallas masks the ragged final block, so no padding.
    TB = min(tb_max, _round_up(B, 8))
    grid = (pl.cdiv(B, TB),)

    out = pl.pallas_call(
        feedforward_kernel,
        out_shape=jax.ShapeDtypeStruct((B, 1), x.dtype),
        grid=grid,
        in_specs=[
            # x: pipelined per batch tile.
            pl.BlockSpec((TB, D), lambda i: (i, 0)),
            # weights / biases: VMEM-resident across all grid steps.
            pl.BlockSpec((D, H), lambda i: (0, 0)),
            pl.BlockSpec((1, H), lambda i: (0, 0)),
            pl.BlockSpec((1, H), lambda i: (0, 0)),
            # b2: scalar in SMEM (avoids a masked vector load + broadcast).
            pl.BlockSpec(memory_space=pltpu.SMEM),
        ],
        out_specs=pl.BlockSpec((TB, 1), lambda i: (i, 0)),
        compiler_params=pltpu.CompilerParams(
            dimension_semantics=("parallel",),   # megacore-shardable on v7x
            vmem_limit_bytes=32 * 1024 * 1024,   # safe on v5e/v6e/v7x
        ),
    )(x, w1, b1, w2, b2)

    return out


def _reference(x, fc1_w, fc1_b, fc2_w, fc2_b):
    h = jnp.maximum(x @ fc1_w.T + fc1_b, 0.0)
    return h @ fc2_w.T + fc2_b


if __name__ == "__main__":
    input_size = 16
    hidden_size = 32

    key = jax.random.PRNGKey(0)
    kx, kw1, kb1, kw2, kb2, kx2 = jax.random.split(key, 6)

    # PyTorch-style Linear parameter init (uniform(-1/sqrt(fan_in), ...)).
    bound1 = 1.0 / (input_size ** 0.5)
    fc1_w = jax.random.uniform(kw1, (hidden_size, input_size),
                               minval=-bound1, maxval=bound1, dtype=jnp.float32)
    fc1_b = jax.random.uniform(kb1, (hidden_size,),
                               minval=-bound1, maxval=bound1, dtype=jnp.float32)
    bound2 = 1.0 / (hidden_size ** 0.5)
    fc2_w = jax.random.uniform(kw2, (1, hidden_size),
                               minval=-bound2, maxval=bound2, dtype=jnp.float32)
    fc2_b = jax.random.uniform(kb2, (1,),
                               minval=-bound2, maxval=bound2, dtype=jnp.float32)

    # Small primary case.
    batch = 8
    x = jax.random.normal(kx, (batch, input_size), dtype=jnp.float32)
    out = jax.block_until_ready(feedforward(x, fc1_w, fc1_b, fc2_w, fc2_b))
    ref = _reference(x, fc1_w, fc1_b, fc2_w, fc2_b)
    assert out.shape == (batch, 1), out.shape
    assert jnp.allclose(out, ref, atol=1e-5, rtol=1e-5), "mismatch vs reference (B=8)"

    # Secondary case exercising a ragged (masked) final batch block.
    batch2 = 300
    x2 = jax.random.normal(kx2, (batch2, input_size), dtype=jnp.float32)
    out2 = jax.block_until_ready(feedforward(x2, fc1_w, fc1_b, fc2_w, fc2_b))
    ref2 = _reference(x2, fc1_w, fc1_b, fc2_w, fc2_b)
    assert out2.shape == (batch2, 1), out2.shape
    assert jnp.allclose(out2, ref2, atol=1e-5, rtol=1e-5), "mismatch vs reference (B=300)"

    print("KERNEL_OK")
</pallas_src>

<mosaic_0001>
module attributes {stable_mosaic.version = 11 : i64} {
  func.func @feedforward_kernel(%arg0: i32, %arg1: memref<8x16xf32, #tpu.memory_space<vmem>>, %arg2: memref<16x32xf32, #tpu.memory_space<vmem>>, %arg3: memref<1x32xf32, #tpu.memory_space<vmem>>, %arg4: memref<1x32xf32, #tpu.memory_space<vmem>>, %arg5: memref<1x1xf32, #tpu.memory_space<smem>>, %arg6: memref<8x1xf32, #tpu.memory_space<vmem>>) attributes {dimension_semantics = [#tpu.dimension_semantics<parallel>], iteration_bounds = array<i64: 1>, scalar_prefetch = 0 : i64, scratch_operands = 0 : i64, tpu.core_type = #tpu.core_type<tc>, window_params = [{transform_indices = @transform_0, window_bounds = array<i64: 8, 16>}, {pipeline_mode = #tpu.pipeline_mode<synchronous>, transform_indices = @transform_1, window_bounds = array<i64: 16, 32>}, {pipeline_mode = #tpu.pipeline_mode<synchronous>, transform_indices = @transform_2, window_bounds = array<i64: 1, 32>}, {pipeline_mode = #tpu.pipeline_mode<synchronous>, transform_indices = @transform_3, window_bounds = array<i64: 1, 32>}, {transform_indices = @transform_4, window_bounds = array<i64: 1, 1>}, {transform_indices = @transform_5, window_bounds = array<i64: 8, 1>}]} {
    %c0 = arith.constant 0 : index
    %c0_0 = arith.constant 0 : index
    %0 = vector.load %arg1[%c0, %c0_0] : memref<8x16xf32, #tpu.memory_space<vmem>>, vector<8x16xf32>
    %c0_1 = arith.constant 0 : index
    %c0_2 = arith.constant 0 : index
    %1 = vector.load %arg2[%c0_1, %c0_2] : memref<16x32xf32, #tpu.memory_space<vmem>>, vector<16x32xf32>
    %cst = arith.constant dense<0.000000e+00> : vector<8x32xf32>
    %2 = tpu.matmul %0, %1, %cst {dimension_numbers = #tpu.dot_dimension_numbers<[1], [0], [0], [1], [0, 0, 1, 1], [], []>} : vector<8x16xf32>, vector<16x32xf32>, vector<8x32xf32> -> vector<8x32xf32>
    %c0_3 = arith.constant 0 : index
    %c0_4 = arith.constant 0 : index
    %3 = vector.load %arg3[%c0_3, %c0_4] : memref<1x32xf32, #tpu.memory_space<vmem>>, vector<1x32xf32>
    %4 = vector.broadcast %3 : vector<1x32xf32> to vector<8x32xf32>
    %5 = arith.addf %2, %4 : vector<8x32xf32>
    %cst_5 = arith.constant 0.000000e+00 : f32
    %6 = vector.broadcast %cst_5 : f32 to vector<8x32xf32>
    %7 = arith.maximumf %5, %6 : vector<8x32xf32>
    %c0_6 = arith.constant 0 : index
    %c0_7 = arith.constant 0 : index
    %8 = vector.load %arg4[%c0_6, %c0_7] : memref<1x32xf32, #tpu.memory_space<vmem>>, vector<1x32xf32>
    %9 = vector.broadcast %8 : vector<1x32xf32> to vector<8x32xf32>
    %10 = arith.mulf %7, %9 : vector<8x32xf32>
    %cst_8 = arith.constant dense<0.000000e+00> : vector<8xf32>
    %11 = vector.multi_reduction <add>, %10, %cst_8 [1] : vector<8x32xf32> to vector<8xf32>
    %12 = vector.shape_cast %11 : vector<8xf32> to vector<8x1xf32>
    %c0_9 = arith.constant 0 : index
    %c0_10 = arith.constant 0 : index
    %13 = memref.load %arg5[%c0_9, %c0_10] : memref<1x1xf32, #tpu.memory_space<smem>>
    %14 = vector.broadcast %13 : f32 to vector<8x1xf32>
    %15 = arith.addf %12, %14 : vector<8x1xf32>
    %c0_11 = arith.constant 0 : index
    %c0_12 = arith.constant 0 : index
    %16 = vector.load %arg6[%c0_11, %c0_12] : memref<8x1xf32, #tpu.memory_space<vmem>>, vector<8x1xf32>
    tpu.vector_store %arg6[%c0_11, %c0_12], %15 {strides = array<i32>} : memref<8x1xf32, #tpu.memory_space<vmem>>, vector<8x1xf32>,
    return
  }
  func.func @transform_0(%arg0: i32) -> (i32, i32) {
    %c0_i32 = arith.constant 0 : i32
    %c0_i32_0 = arith.constant 0 : i32
    return %arg0, %c0_i32 : i32, i32
  }
  func.func @transform_1(%arg0: i32) -> (i32, i32) {
    %c0_i32 = arith.constant 0 : i32
    %c0_i32_0 = arith.constant 0 : i32
    %c0_i32_1 = arith.constant 0 : i32
    return %c0_i32, %c0_i32_0 : i32, i32
  }
  func.func @transform_2(%arg0: i32) -> (i32, i32) {
    %c0_i32 = arith.constant 0 : i32
    %c0_i32_0 = arith.constant 0 : i32
    %c0_i32_1 = arith.constant 0 : i32
    return %c0_i32, %c0_i32_0 : i32, i32
  }
  func.func @transform_3(%arg0: i32) -> (i32, i32) {
    %c0_i32 = arith.constant 0 : i32
    %c0_i32_0 = arith.constant 0 : i32
    %c0_i32_1 = arith.constant 0 : i32
    return %c0_i32, %c0_i32_0 : i32, i32
  }
  func.func @transform_4(%arg0: i32) -> (i32, i32) {
    %c0_i32 = arith.constant 0 : i32
    %c0_i32_0 = arith.constant 0 : i32
    %c0_i32_1 = arith.constant 0 : i32
    return %c0_i32, %c0_i32_0 : i32, i32
  }
  func.func @transform_5(%arg0: i32) -> (i32, i32) {
    %c0_i32 = arith.constant 0 : i32
    %c0_i32_0 = arith.constant 0 : i32
    return %arg0, %c0_i32 : i32, i32
  }
}

</mosaic_0001>

<bundles_post_ra>
// kernel: tpu_custom_call.1
= control target key start
LH: loop header
LB: loop body
LE: loop exit
PB: predicated region body
PF: predicated region fallthrough
CT: control target
= control target key end

     0   :  { %11 = vsyncpa [#allocation4], 0  ;;  %s306_s0 = inlined_call_operand.hbm [shape: f32[8,16], index: 0, kind: input, shape index: {}]   ;;  %s307_s1 = inlined_call_operand.hbm [shape: f32[16,32], index: 1, kind: input, shape index: {}]   ;;  %s308_s2 = inlined_call_operand.vmem [shape: f32[1,32], index: 2, kind: input, shape index: {}]   ;;  %s309_s3 = inlined_call_operand.vmem [shape: f32[1,32], index: 3, kind: input, shape index: {}]   ;;  %s310_s4 = inlined_call_operand.<no memory space> [shape: f32[1,1], index: 4, kind: input, shape index: {}]   ;;  %s311_s5 = inlined_call_operand.vmem [shape: f32[8,1], index: 5, kind: output, shape index: {}]  }
   0x1   :  { %12 = vsyncpa [#allocation6], 0  ;;  %s226_s18 = smov [#allocation3]   ;;  %s227_s20 = smov [#allocation5]  }
   0x2   :  { %s19_s19 = sshll.u32 %s226_s18, 4  ;;  %s28_s21 = sshll.u32 %s227_s20, 4  ;;  %s20_s19 = int_to_ptr.vmem [resolvable:$true] %s19_s19  ;;  %s263_s21 = int_to_ptr.vmem [resolvable:$true] %s28_s21 }
   0x3   :  { %s178_s24 = scalar_lea.hbm %s306_s0, 128 }
   0x4   :  { %p179_p0 = scmp.ne.s32.totalorder %s306_s0, %s178_s24  ;;  %p182_p1 = scmp.lt.u32.totalorder %s178_s24, %s306_s0 }
   0x6   :  { %p184_p2 = pnand %p182_p1, %p179_p0 }
   0x8   :  { %187 = shalt.err (!%p184_p2)
}
   0x9   :  { %s188_s29 = scalar_lea.vmem %s20_s19, 128  ;;  %p193_p4 = scmp.lt.s32.totalorder %s20_s19, %s20_s19 }
   0xa   :  { %p189_p3 = scmp.ne.s32.totalorder %s20_s19, %s188_s29  ;;  %p194_p5 = scmp.lt.s32.totalorder %s188_s29, %s188_s29 }
   0xc   :  { %p195_p6 = por %p194_p5, %p193_p4 }
   0xe   :  { %p196_p7 = pnand %p195_p6, %p189_p3 }
  0x10   :  { %199 = shalt.err (!%p196_p7)
}
  0x11   :  { %22 = dma.hbm_to_vmem [thread:$0]  %s306_s0, 128, %s20_s19, [#allocation4]  }
  0x12   :  { %s200_s9 = scalar_lea.hbm %s307_s1, 256 }
  0x13   :  { %p201_p8 = scmp.ne.s32.totalorder %s307_s1, %s200_s9  ;;  %p204_p9 = scmp.lt.u32.totalorder %s200_s9, %s307_s1 }
  0x15   :  { %p206_p10 = pnand %p204_p9, %p201_p8 }
  0x17   :  { %209 = shalt.err (!%p206_p10)
}
  0x18   :  { %s210_s14 = scalar_lea.vmem %s263_s21, 256  ;;  %p215_p12 = scmp.lt.s32.totalorder %s263_s21, %s263_s21 }
  0x19   :  { %p211_p11 = scmp.ne.s32.totalorder %s263_s21, %s210_s14  ;;  %p216_p13 = scmp.lt.s32.totalorder %s210_s14, %s210_s14 }
  0x1b   :  { %p217_p0 = por %p216_p13, %p215_p12 }
  0x1d   :  { %p218_p1 = pnand %p217_p0, %p211_p11 }
  0x1f   :  { %221 = shalt.err (!%p218_p1)
}
  0x20   :  { %s228_s0 = smov 128   ;;  %s229_s15 = smov 8  }
  0x21   :  { %34 = dma.hbm_to_vmem [thread:$0]  %s307_s1, 256, %s263_s21, [#allocation6], %s228_s0, %s228_s0, %s229_s15  }
  0x22   :  { %222 = dma.done.wait [#allocation4], 128  }
  0x23   :  { %223 = vsyncadd [#allocation4], 4294967168 }
  0x24   :  { %224 = dma.done.wait [#allocation6], 256  }
  0x25   :  { %225 = vsyncadd [#allocation6], 4294967040  ;;  %v230_v0 = vmov 0.0|0.0   ;;  %vm231_vm0 = vmmov 0   ;;  %v232_v1 = vmov 0.0   ;;  %v48_v2 = vld [vmem:[#allocation5] sm:$0xff]  ;;  %v145_v14 = vstv %s310_s4 }
  0x26   :  { %168 = vmatprep.subr.bf16.mxu0 %v230_v0  ;;  %165 = vmatprep.mubr.msk.f32.mxu0 %vm231_vm0, %v232_v1  ;;  %v49_v3 = vld [vmem:[#allocation5 + $0x8] sm:$0xff]  ;;  %v47_v5 = vld [vmem:[#allocation3] sm:$0xff]  ;;  %vm57_vm1 = vcmask 130048   ;;  %vm140_vm2 = vcmask 261120   ;;  %vm147_vm3 = vcmask 7168  }
  0x27   :  { %v169_v4 = vpack.c.bf16 %v49_v3, %v48_v2  ;;  %v155_v6 = vld [vmem:[%s308_s2] ss:$0 sm:$0xff] }
  0x28   :  { %v157_v10 = vld [vmem:[%s309_s3] ss:$0 sm:$0xff] }
  0x29   :  { %170 = vmatpush3.bf16.msra.mxu0 %v169_v4 }
  0x2c   :  { %166 = vmatmul.mubr.msk.f32.vlgmr.msra.gmra.mrb[0].mxu0 %vm57_vm1, %v47_v5 }
  0xff   :  { %v127_v7 = vpop.f32.mrb[0].mxu0 }
 0x100   :  { %v128_v8 = vadd.f32 %v155_v6, %v127_v7  ;;  %v167_v9 = vpop.f32.mrb[1].mxu0 }
 0x102   :  { %v131_v11 = vmax.f32 %v128_v8, 0.0 }
 0x104   :  { %v139_v12 = vmul.f32 %v157_v10, %v131_v11 }
 0x106   :  { %v141_v13 = vsel %vm140_vm2, %v139_v12, 0.0 }
 0x107   :  { %142 = vadd.xlane.f32.xlu0 %v141_v13 }
 0x194   :  { %v143_v15 = vpop.xlane.xlu0 %142 }
 0x195   :  { %v146_v16 = vadd.f32 %v145_v14, %v143_v15 }
 0x197   :  { %148 = vst.msk [vmem:[%s311_s5] sm:$0xff] %vm147_vm3, %v146_v16 }
 0x198   :  { %153 = vsyncpa [#allocation4], 1 }
 0x199   :  { %154 = vsyncpa [#allocation6], 1 }

</bundles_post_ra>
